<compile_context>
chip_gen: v7x
topology: tpu7x:2x2x1
jax: 0.10.0
libtpu: 0.0.40
codegen_flags: <defaults>
</compile_context>

<pallas_src>
import functools
import math

import jax
import jax.numpy as jnp
from jax import lax
from jax.experimental import pallas as pl
from jax.experimental.pallas import tpu as pltpu


def _mhsa_kernel(z_ref, wqkv_ref, wo_ref, bo_ref, o_ref, concat_ref, *,
                 num_heads, head_dim):
    # z_ref:      (N, D)         bf16 activations for ONE batch element
    # wqkv_ref:   (3, H, D, hd)  bf16 per-head weight slabs (1/sqrt(D) folded into Q)
    # wo_ref:     (D, D)         bf16 output projection (W_o^T)
    # bo_ref:     (1, D)         f32 output bias
    # o_ref:      (N, D)         f32 output
    # concat_ref: (N, D)         bf16 VMEM scratch holding the head-concat
    z = z_ref[...]                                                # (N, D) bf16

    # Short static head loop (H=2): fully unrolled on purpose (see header comment).
    for h in range(num_heads):
        # Per-head projections: weight selection is a free leading-axis index,
        # contraction K=D is full-depth on the MXU, no lane-axis qkv slicing.
        q_h = jnp.dot(z, wqkv_ref[0, h], preferred_element_type=jnp.float32)
        k_h = jnp.dot(z, wqkv_ref[1, h], preferred_element_type=jnp.float32)
        v_h = jnp.dot(z, wqkv_ref[2, h],
                      preferred_element_type=jnp.float32).astype(jnp.bfloat16)

        # scores = q @ k^T (attention scale already folded into the Q weights).
        # Contract the last dims directly -> no materialized transpose of k.
        scores = lax.dot_general(
            q_h.astype(jnp.bfloat16), k_h.astype(jnp.bfloat16),
            (((1,), (1,)), ((), ())),
            preferred_element_type=jnp.float32)                   # (N, N) f32

        # Numerically-stable softmax, normalization deferred.
        m = jnp.max(scores, axis=-1, keepdims=True)
        e = jnp.exp(scores - m)                                   # (N, N) f32
        s = jnp.sum(e, axis=-1, keepdims=True)                    # (N, 1) f32

        # Unnormalized attention applied to v, then scale the small (N, hd)
        # result with the (otherwise idle) EUP reciprocal.
        o_h = jnp.dot(e.astype(jnp.bfloat16), v_h,
                      preferred_element_type=jnp.float32)         # (N, hd) f32
        o_h = o_h * pl.reciprocal(s, approx=True)

        # Head-concat: static-lane-offset store into the (N, D) scratch.
        c = h * head_dim
        concat_ref[:, c:c + head_dim] = o_h.astype(jnp.bfloat16)

    # Single fused output projection with full K=D contraction + one bias add.
    out = jnp.dot(concat_ref[...], wo_ref[...],
                  preferred_element_type=jnp.float32)             # (N, D) f32
    o_ref[...] = (out + bo_ref[...]).astype(o_ref.dtype)


def mhsa_pallas(z, w_qkv_t, w_o_t, b_o, *, num_heads):
    """z: (B, N, D); w_qkv_t: (D, 3D) = W_qkv^T; w_o_t: (D, D) = W_o^T; b_o: (D,).

    NOTE: W_qkv output features are assumed ordered [Q | K | V] with heads
    contiguous inside each group (matches nn.Linear(emb, 3*emb) followed by
    reshape(B, N, 3, H, hd) in the PyTorch module).
    """
    B, N, D = z.shape
    assert D % num_heads == 0
    hd = D // num_heads
    inv_sqrt_d = 1.0 / (float(D) ** 0.5)

    # ---- Parameter prep (amortized once per model in practice) ----------------
    # Repack W_qkv^T (D, 3D) -> per-head slabs (3, H, D, hd); fold the attention
    # scale into the Q slabs; pre-cast weights to bf16 (halves weight DMA and
    # feeds the MXU bf16 path directly).
    w = w_qkv_t.reshape(D, 3, num_heads, hd).transpose(1, 2, 0, 3)   # (3, H, D, hd)
    w = w.at[0].multiply(inv_sqrt_d)
    w_qkv_p = w.astype(jnp.bfloat16)
    w_o_p = w_o_t.astype(jnp.bfloat16)
    b_o2 = b_o.reshape(1, D).astype(jnp.float32)

    # Activations to bf16 at the boundary (was an in-kernel cast before):
    # identical result, half the DMA bytes / input double-buffer footprint.
    z16 = z.astype(jnp.bfloat16)

    # ---- Scoped VMEM limit sized from the actual per-step footprint -----------
    bb16, bf32 = 2, 4
    step_bytes = (
        2 * N * D * bb16                               # z tile (double-buffered)
        + 2 * N * D * bf32                             # out tile (double-buffered)
        + 2 * (3 * D * D * bb16 + D * D * bb16 + D * bf32)  # weights + bias
        + N * D * bb16                                 # concat scratch
        + 8 * N * max(N, D) * bf32                     # per-head intermediates headroom
    )
    vmem_limit = int(min(max(4 * step_bytes, 32 << 20), 48 << 20))  # <= ~56 MiB v7x ceiling

    kernel = functools.partial(_mhsa_kernel, num_heads=num_heads, head_dim=hd)

    out = pl.pallas_call(
        kernel,
        out_shape=jax.ShapeDtypeStruct((B, N, D), z.dtype),
        grid_spec=pltpu.PrefetchScalarGridSpec(
            num_scalar_prefetch=0,
            # Batch in the grid: >=2 independent "parallel" steps (feeds both v7x
            # TensorCores), per-step working set bounded to one batch element.
            grid=(B,),
            in_specs=[
                pl.BlockSpec((None, N, D), lambda b: (b, 0, 0)),          # z (bf16)
                pl.BlockSpec((3, num_heads, D, hd), lambda b: (0, 0, 0, 0)),  # W_qkv slabs
                pl.BlockSpec((D, D), lambda b: (0, 0)),                   # W_o (bf16)
                pl.BlockSpec((1, D), lambda b: (0, 0)),                   # b_o (f32)
            ],
            out_specs=pl.BlockSpec((None, N, D), lambda b: (b, 0, 0)),
            scratch_shapes=[pltpu.VMEM((N, D), jnp.bfloat16)],            # head-concat
        ),
        compiler_params=pltpu.CompilerParams(
            dimension_semantics=("parallel",),
            vmem_limit_bytes=vmem_limit),
    )(z16, w_qkv_p, w_o_p, b_o2)

    return out


def mhsa_reference(z, w_qkv_t, w_o_t, b_o, *, num_heads):
    """Pure-JAX f32 reference mirroring the PyTorch forward."""
    B, N, D = z.shape
    hd = D // num_heads
    qkv = z @ w_qkv_t                                            # (B, N, 3D)
    qkv = qkv.reshape(B, N, 3, num_heads, hd).transpose(2, 0, 3, 1, 4)
    q, k, v = qkv[0], qkv[1], qkv[2]                             # (B, H, N, hd)
    attn = (q @ jnp.swapaxes(k, -2, -1)) / (D ** 0.5)            # sqrt(emb_dim), as in module
    attn = jax.nn.softmax(attn, axis=-1)
    out = (attn @ v).transpose(0, 2, 1, 3).reshape(B, N, D)
    return out @ w_o_t + b_o


if __name__ == "__main__":
    # Small shapes consistent with the module defaults: emb_dim=128, head=2.
    # N=16 keeps the bf16 activation tile sublane-packed (multiple of 16 rows).
    B, N, D, H = 2, 16, 128, 2

    key = jax.random.PRNGKey(0)
    k_z, k_qkv, k_wo, k_bo = jax.random.split(key, 4)

    z = jax.random.normal(k_z, (B, N, D), dtype=jnp.float32)

    # Deterministic parameter init (Kaiming-uniform-ish bounds like torch.nn.Linear).
    bound = 1.0 / math.sqrt(D)
    w_qkv_t = jax.random.uniform(k_qkv, (D, 3 * D), minval=-bound,
                                 maxval=bound, dtype=jnp.float32)   # (in, out) = W_qkv^T
    w_o_t = jax.random.uniform(k_wo, (D, D), minval=-bound,
                               maxval=bound, dtype=jnp.float32)     # (in, out) = W_o^T
    b_o = jax.random.uniform(k_bo, (D,), minval=-bound,
                             maxval=bound, dtype=jnp.float32)

    out = mhsa_pallas(z, w_qkv_t, w_o_t, b_o, num_heads=H)
    out = jax.block_until_ready(out)

    ref = mhsa_reference(z, w_qkv_t, w_o_t, b_o, num_heads=H)
    assert out.shape == (B, N, D)
    # bf16 MXU operands + approx EUP reciprocal -> relaxed (but still tight)
    # tolerance vs. the f32 reference.
    max_err = float(jnp.max(jnp.abs(out - ref)))
    assert jnp.allclose(out, ref, atol=3e-2, rtol=3e-2), (
        "mismatch vs reference: max abs diff = %s" % max_err)

    print("KERNEL_OK")
</pallas_src>

<mosaic_0001>
module attributes {stable_mosaic.version = 11 : i64} {
  func.func @_mhsa_kernel(%arg0: i32, %arg1: memref<1x16x128xbf16, #tpu.memory_space<vmem>>, %arg2: memref<3x2x128x64xbf16, #tpu.memory_space<vmem>>, %arg3: memref<128x128xbf16, #tpu.memory_space<vmem>>, %arg4: memref<1x128xf32, #tpu.memory_space<vmem>>, %arg5: memref<1x16x128xf32, #tpu.memory_space<vmem>>, %arg6: memref<16x128xbf16, #tpu.memory_space<vmem>>) attributes {dimension_semantics = [#tpu.dimension_semantics<parallel>], iteration_bounds = array<i64: 2>, scalar_prefetch = 0 : i64, scratch_operands = 1 : i64, tpu.core_type = #tpu.core_type<tc>, window_params = [{transform_indices = @transform_0, window_bounds = array<i64: 1, 16, 128>}, {pipeline_mode = #tpu.pipeline_mode<synchronous>, transform_indices = @transform_1, window_bounds = array<i64: 3, 2, 128, 64>}, {pipeline_mode = #tpu.pipeline_mode<synchronous>, transform_indices = @transform_2, window_bounds = array<i64: 128, 128>}, {pipeline_mode = #tpu.pipeline_mode<synchronous>, transform_indices = @transform_3, window_bounds = array<i64: 1, 128>}, {transform_indices = @transform_4, window_bounds = array<i64: 1, 16, 128>}]} {
    %c0 = arith.constant 0 : index
    %c0_0 = arith.constant 0 : index
    %c0_1 = arith.constant 0 : index
    %0 = vector.load %arg1[%c0, %c0_0, %c0_1] : memref<1x16x128xbf16, #tpu.memory_space<vmem>>, vector<1x16x128xbf16>
    %1 = vector.shape_cast %0 : vector<1x16x128xbf16> to vector<16x128xbf16>
    %c0_2 = arith.constant 0 : index
    %c0_3 = arith.constant 0 : index
    %c0_4 = arith.constant 0 : index
    %c0_5 = arith.constant 0 : index
    %2 = vector.load %arg2[%c0_2, %c0_3, %c0_4, %c0_5] : memref<3x2x128x64xbf16, #tpu.memory_space<vmem>>, vector<1x1x128x64xbf16>
    %3 = vector.shape_cast %2 : vector<1x1x128x64xbf16> to vector<128x64xbf16>
    %cst = arith.constant dense<0.000000e+00> : vector<16x64xf32>
    %4 = tpu.matmul %1, %3, %cst {dimension_numbers = #tpu.dot_dimension_numbers<[1], [0], [0], [1], [0, 0, 1, 1], [], []>} : vector<16x128xbf16>, vector<128x64xbf16>, vector<16x64xf32> -> vector<16x64xf32>
    %c1 = arith.constant 1 : index
    %c0_6 = arith.constant 0 : index
    %c0_7 = arith.constant 0 : index
    %c0_8 = arith.constant 0 : index
    %5 = vector.load %arg2[%c1, %c0_6, %c0_7, %c0_8] : memref<3x2x128x64xbf16, #tpu.memory_space<vmem>>, vector<1x1x128x64xbf16>
    %6 = vector.shape_cast %5 : vector<1x1x128x64xbf16> to vector<128x64xbf16>
    %cst_9 = arith.constant dense<0.000000e+00> : vector<16x64xf32>
    %7 = tpu.matmul %1, %6, %cst_9 {dimension_numbers = #tpu.dot_dimension_numbers<[1], [0], [0], [1], [0, 0, 1, 1], [], []>} : vector<16x128xbf16>, vector<128x64xbf16>, vector<16x64xf32> -> vector<16x64xf32>
    %c2 = arith.constant 2 : index
    %c0_10 = arith.constant 0 : index
    %c0_11 = arith.constant 0 : index
    %c0_12 = arith.constant 0 : index
    %8 = vector.load %arg2[%c2, %c0_10, %c0_11, %c0_12] : memref<3x2x128x64xbf16, #tpu.memory_space<vmem>>, vector<1x1x128x64xbf16>
    %9 = vector.shape_cast %8 : vector<1x1x128x64xbf16> to vector<128x64xbf16>
    %cst_13 = arith.constant dense<0.000000e+00> : vector<16x64xf32>
    %10 = tpu.matmul %1, %9, %cst_13 {dimension_numbers = #tpu.dot_dimension_numbers<[1], [0], [0], [1], [0, 0, 1, 1], [], []>} : vector<16x128xbf16>, vector<128x64xbf16>, vector<16x64xf32> -> vector<16x64xf32>
    %11 = arith.truncf %10 : vector<16x64xf32> to vector<16x64xbf16>
    %12 = arith.truncf %4 : vector<16x64xf32> to vector<16x64xbf16>
    %13 = arith.truncf %7 : vector<16x64xf32> to vector<16x64xbf16>
    %cst_14 = arith.constant dense<0.000000e+00> : vector<16x16xf32>
    %14 = tpu.matmul %12, %13, %cst_14 {dimension_numbers = #tpu.dot_dimension_numbers<[1], [1], [0], [0], [0, 0, 1, 0], [], []>} : vector<16x64xbf16>, vector<16x64xbf16>, vector<16x16xf32> -> vector<16x16xf32>
    %cst_15 = arith.constant dense<0xFF800000> : vector<16xf32>
    %15 = vector.multi_reduction <maximumf>, %14, %cst_15 [1] : vector<16x16xf32> to vector<16xf32>
    %16 = vector.shape_cast %15 : vector<16xf32> to vector<16x1xf32>
    %17 = vector.broadcast %16 : vector<16x1xf32> to vector<16x16xf32>
    %18 = arith.subf %14, %17 : vector<16x16xf32>
    %19 = math.exp %18 : vector<16x16xf32>
    %cst_16 = arith.constant dense<0.000000e+00> : vector<16xf32>
    %20 = vector.multi_reduction <add>, %19, %cst_16 [1] : vector<16x16xf32> to vector<16xf32>
    %21 = vector.shape_cast %20 : vector<16xf32> to vector<16x1xf32>
    %22 = arith.truncf %19 : vector<16x16xf32> to vector<16x16xbf16>
    %cst_17 = arith.constant dense<0.000000e+00> : vector<16x64xf32>
    %23 = tpu.matmul %22, %11, %cst_17 {dimension_numbers = #tpu.dot_dimension_numbers<[1], [0], [0], [1], [0, 0, 1, 1], [], []>} : vector<16x16xbf16>, vector<16x64xbf16>, vector<16x64xf32> -> vector<16x64xf32>
    %24 = tpu.reciprocal %21 {approx = true} : vector<16x1xf32> -> vector<16x1xf32>
    %25 = vector.broadcast %24 : vector<16x1xf32> to vector<16x64xf32>
    %26 = arith.mulf %23, %25 : vector<16x64xf32>
    %27 = arith.truncf %26 : vector<16x64xf32> to vector<16x64xbf16>
    %c0_18 = arith.constant 0 : index
    %c0_19 = arith.constant 0 : index
    %28 = vector.load %arg6[%c0_18, %c0_19] : memref<16x128xbf16, #tpu.memory_space<vmem>>, vector<16x64xbf16>
    tpu.vector_store %arg6[%c0_18, %c0_19], %27 {strides = array<i32>} : memref<16x128xbf16, #tpu.memory_space<vmem>>, vector<16x64xbf16>,
    %c0_20 = arith.constant 0 : index
    %c1_21 = arith.constant 1 : index
    %c0_22 = arith.constant 0 : index
    %c0_23 = arith.constant 0 : index
    %29 = vector.load %arg2[%c0_20, %c1_21, %c0_22, %c0_23] : memref<3x2x128x64xbf16, #tpu.memory_space<vmem>>, vector<1x1x128x64xbf16>
    %30 = vector.shape_cast %29 : vector<1x1x128x64xbf16> to vector<128x64xbf16>
    %cst_24 = arith.constant dense<0.000000e+00> : vector<16x64xf32>
    %31 = tpu.matmul %1, %30, %cst_24 {dimension_numbers = #tpu.dot_dimension_numbers<[1], [0], [0], [1], [0, 0, 1, 1], [], []>} : vector<16x128xbf16>, vector<128x64xbf16>, vector<16x64xf32> -> vector<16x64xf32>
    %c1_25 = arith.constant 1 : index
    %c1_26 = arith.constant 1 : index
    %c0_27 = arith.constant 0 : index
    %c0_28 = arith.constant 0 : index
    %32 = vector.load %arg2[%c1_25, %c1_26, %c0_27, %c0_28] : memref<3x2x128x64xbf16, #tpu.memory_space<vmem>>, vector<1x1x128x64xbf16>
    %33 = vector.shape_cast %32 : vector<1x1x128x64xbf16> to vector<128x64xbf16>
    %cst_29 = arith.constant dense<0.000000e+00> : vector<16x64xf32>
    %34 = tpu.matmul %1, %33, %cst_29 {dimension_numbers = #tpu.dot_dimension_numbers<[1], [0], [0], [1], [0, 0, 1, 1], [], []>} : vector<16x128xbf16>, vector<128x64xbf16>, vector<16x64xf32> -> vector<16x64xf32>
    %c2_30 = arith.constant 2 : index
    %c1_31 = arith.constant 1 : index
    %c0_32 = arith.constant 0 : index
    %c0_33 = arith.constant 0 : index
    %35 = vector.load %arg2[%c2_30, %c1_31, %c0_32, %c0_33] : memref<3x2x128x64xbf16, #tpu.memory_space<vmem>>, vector<1x1x128x64xbf16>
    %36 = vector.shape_cast %35 : vector<1x1x128x64xbf16> to vector<128x64xbf16>
    %cst_34 = arith.constant dense<0.000000e+00> : vector<16x64xf32>
    %37 = tpu.matmul %1, %36, %cst_34 {dimension_numbers = #tpu.dot_dimension_numbers<[1], [0], [0], [1], [0, 0, 1, 1], [], []>} : vector<16x128xbf16>, vector<128x64xbf16>, vector<16x64xf32> -> vector<16x64xf32>
    %38 = arith.truncf %37 : vector<16x64xf32> to vector<16x64xbf16>
    %39 = arith.truncf %31 : vector<16x64xf32> to vector<16x64xbf16>
    %40 = arith.truncf %34 : vector<16x64xf32> to vector<16x64xbf16>
    %cst_35 = arith.constant dense<0.000000e+00> : vector<16x16xf32>
    %41 = tpu.matmul %39, %40, %cst_35 {dimension_numbers = #tpu.dot_dimension_numbers<[1], [1], [0], [0], [0, 0, 1, 0], [], []>} : vector<16x64xbf16>, vector<16x64xbf16>, vector<16x16xf32> -> vector<16x16xf32>
    %cst_36 = arith.constant dense<0xFF800000> : vector<16xf32>
    %42 = vector.multi_reduction <maximumf>, %41, %cst_36 [1] : vector<16x16xf32> to vector<16xf32>
    %43 = vector.shape_cast %42 : vector<16xf32> to vector<16x1xf32>
    %44 = vector.broadcast %43 : vector<16x1xf32> to vector<16x16xf32>
    %45 = arith.subf %41, %44 : vector<16x16xf32>
    %46 = math.exp %45 : vector<16x16xf32>
    %cst_37 = arith.constant dense<0.000000e+00> : vector<16xf32>
    %47 = vector.multi_reduction <add>, %46, %cst_37 [1] : vector<16x16xf32> to vector<16xf32>
    %48 = vector.shape_cast %47 : vector<16xf32> to vector<16x1xf32>
    %49 = arith.truncf %46 : vector<16x16xf32> to vector<16x16xbf16>
    %cst_38 = arith.constant dense<0.000000e+00> : vector<16x64xf32>
    %50 = tpu.matmul %49, %38, %cst_38 {dimension_numbers = #tpu.dot_dimension_numbers<[1], [0], [0], [1], [0, 0, 1, 1], [], []>} : vector<16x16xbf16>, vector<16x64xbf16>, vector<16x64xf32> -> vector<16x64xf32>
    %51 = tpu.reciprocal %48 {approx = true} : vector<16x1xf32> -> vector<16x1xf32>
    %52 = vector.broadcast %51 : vector<16x1xf32> to vector<16x64xf32>
    %53 = arith.mulf %50, %52 : vector<16x64xf32>
    %54 = arith.truncf %53 : vector<16x64xf32> to vector<16x64xbf16>
    %c0_39 = arith.constant 0 : index
    %c64 = arith.constant 64 : index
    %55 = vector.load %arg6[%c0_39, %c64] : memref<16x128xbf16, #tpu.memory_space<vmem>>, vector<16x64xbf16>
    tpu.vector_store %arg6[%c0_39, %c64], %54 {strides = array<i32>} : memref<16x128xbf16, #tpu.memory_space<vmem>>, vector<16x64xbf16>,
    %c0_40 = arith.constant 0 : index
    %c0_41 = arith.constant 0 : index
    %56 = vector.load %arg6[%c0_40, %c0_41] : memref<16x128xbf16, #tpu.memory_space<vmem>>, vector<16x128xbf16>
    %c0_42 = arith.constant 0 : index
    %c0_43 = arith.constant 0 : index
    %57 = vector.load %arg3[%c0_42, %c0_43] : memref<128x128xbf16, #tpu.memory_space<vmem>>, vector<128x128xbf16>
    %cst_44 = arith.constant dense<0.000000e+00> : vector<16x128xf32>
    %58 = tpu.matmul %56, %57, %cst_44 {dimension_numbers = #tpu.dot_dimension_numbers<[1], [0], [0], [1], [0, 0, 1, 1], [], []>} : vector<16x128xbf16>, vector<128x128xbf16>, vector<16x128xf32> -> vector<16x128xf32>
    %c0_45 = arith.constant 0 : index
    %c0_46 = arith.constant 0 : index
    %59 = vector.load %arg4[%c0_45, %c0_46] : memref<1x128xf32, #tpu.memory_space<vmem>>, vector<1x128xf32>
    %60 = vector.broadcast %59 : vector<1x128xf32> to vector<16x128xf32>
    %61 = arith.addf %58, %60 : vector<16x128xf32>
    %c0_47 = arith.constant 0 : index
    %c0_48 = arith.constant 0 : index
    %c0_49 = arith.constant 0 : index
    %62 = vector.load %arg5[%c0_47, %c0_48, %c0_49] : memref<1x16x128xf32, #tpu.memory_space<vmem>>, vector<1x16x128xf32>
    %63 = vector.shape_cast %62 : vector<1x16x128xf32> to vector<16x128xf32>
    %64 = vector.shape_cast %61 : vector<16x128xf32> to vector<1x16x128xf32>
    tpu.vector_store %arg5[%c0_47, %c0_48, %c0_49], %64 {strides = array<i32>} : memref<1x16x128xf32, #tpu.memory_space<vmem>>, vector<1x16x128xf32>,
    return
  }
  func.func @transform_0(%arg0: i32) -> (i32, i32, i32) {
    %c0_i32 = arith.constant 0 : i32
    %c0_i32_0 = arith.constant 0 : i32
    %c0_i32_1 = arith.constant 0 : i32
    return %arg0, %c0_i32, %c0_i32_0 : i32, i32, i32
  }
  func.func @transform_1(%arg0: i32) -> (i32, i32, i32, i32) {
    %c0_i32 = arith.constant 0 : i32
    %c0_i32_0 = arith.constant 0 : i32
    %c0_i32_1 = arith.constant 0 : i32
    %c0_i32_2 = arith.constant 0 : i32
    %c0_i32_3 = arith.constant 0 : i32
    return %c0_i32, %c0_i32_0, %c0_i32_1, %c0_i32_2 : i32, i32, i32, i32
  }
  func.func @transform_2(%arg0: i32) -> (i32, i32) {
    %c0_i32 = arith.constant 0 : i32
    %c0_i32_0 = arith.constant 0 : i32
    %c0_i32_1 = arith.constant 0 : i32
    return %c0_i32, %c0_i32_0 : i32, i32
  }
  func.func @transform_3(%arg0: i32) -> (i32, i32) {
    %c0_i32 = arith.constant 0 : i32
    %c0_i32_0 = arith.constant 0 : i32
    %c0_i32_1 = arith.constant 0 : i32
    return %c0_i32, %c0_i32_0 : i32, i32
  }
  func.func @transform_4(%arg0: i32) -> (i32, i32, i32) {
    %c0_i32 = arith.constant 0 : i32
    %c0_i32_0 = arith.constant 0 : i32
    %c0_i32_1 = arith.constant 0 : i32
    return %arg0, %c0_i32, %c0_i32_0 : i32, i32, i32
  }
}

</mosaic_0001>

<bundles_post_ra>
// kernel: tpu_custom_call.1
= control target key start
LH: loop header
LB: loop body
LE: loop exit
PB: predicated region body
PF: predicated region fallthrough
CT: control target
= control target key end

     0   :  { %9 = vsyncpa [#allocation4], 0  ;;  %s2272_s0 = inlined_call_operand.vmem [shape: bf16[2,16,128], index: 0, kind: input, shape index: {}]   ;;  %s2273_s1 = inlined_call_operand.vmem [shape: bf16[3,2,128,64], index: 1, kind: input, shape index: {}]   ;;  %s2274_s2 = inlined_call_operand.vmem [shape: bf16[128,128], index: 2, kind: input, shape index: {}]   ;;  %s2275_s3 = inlined_call_operand.vmem [shape: f32[1,128], index: 3, kind: input, shape index: {}]   ;;  %s2276_s4 = inlined_call_operand.hbm [shape: f32[2,16,128], index: 4, kind: output, shape index: {}]  }
   0x1   :  { %11 = vsyncpa [#allocation4 + $0x1], 0  ;;  %s1879_s15 = smov 0   ;;  %s1881_s16 = smov 0  }
   0x2   :  { %s1883_s17 = smov 0   ;;  %s1885_s18 = smov 0  }
   0x3 LB: > { %s1900_s19 = sadd.s32 4294967295, %s1846_s18   ;;  %s1276_s20 = sadd.s32 4294967294, %s1846_s18   ;;  %s1846_s18 = sphi %s1885_s18, %s2282_s18   ;;  %s1842_s17 = sphi %s1883_s17, %s2281_s17   ;;  %s1838_s16 = sphi %s1881_s16, %s2280_s16   ;;  %s1834_s15 = sphi %s1879_s15, %s2279_s15  }
   0x4   : > { %s1904_s21 = sadd.s32 1, %s1846_s18   ;;  %s113_s22 = sadd.s32 1, %s1842_s17 }
   0x5   : > { %s110_s23 = ssub.s32 %s1846_s18, %s1904_s21  ;;  %p123_p0 = scmp.ne.s32.totalorder %s1842_s17, %s1838_s16 }
   0x6   : > { %p111_p1 = scmp.eq.s32.totalorder %s110_s23, 0  ;;  %p124_p2 = scmp.eq.s32.totalorder %s1900_s19, 1 }
   0x7   : > { %p129_p3 = scmp.ne.s32.totalorder %s1838_s16, %s1834_s15  ;;  %p130_p4 = scmp.eq.s32.totalorder %s1276_s20, 1 }
   0x8   : > { %s1915_s24 = scalar_select %p111_p1, %s1842_s17, %s113_s22  }
   0x9   : > { %p1917_p5 = por %p124_p2, %p123_p0  ;;  %p1921_p6 = por %p130_p4, %p129_p3 }
   0xa   : > { %p1279_p7 = scmp.ge.s32.totalorder %s1846_s18, 1  ;;  %p165_p8 = scmp.lt.s32.totalorder %s1846_s18, 3 }
   0xc   : > { %p166_p9 = pnand %p1279_p7, %p165_p8 }
   0xd   : > { %v1711_v0 = vld [vmem:[%s2273_s1 + $0x80] sm:$0xff] (!%p166_p9)   ;;  %v1848_v1 = vmov (!%p166_p9), 0.0   ;;  %v1712_v2 = vld [vmem:[%s2273_s1 + $0x88] sm:$0xff] (!%p166_p9)   ;;  %vm1849_vm0 = vmmov (!%p166_p9), 0   ;;  %p191_p10 = scmp.lt.s32.totalorder (!%p166_p9), %s1900_s19, 1  ;;  %v1714_v5 = vld [vmem:[%s2273_s1 + $0x90] sm:$0xff] (!%p166_p9)  }
   0xe   : > { %169 = sbr.rel (%p166_p9) target bundleno = 1842 (0x732), region = 36  ;;  %1523 = vmatprep.subr.bf16.mxu1 (!%p166_p9), %v1848_v1  ;;  %1503 = vmatprep.subr.bf16.mxu0 (!%p166_p9), %v1848_v1  ;;  %v1713_v3 = vld [vmem:[%s2273_s1] sm:$0xff] (!%p166_p9)   ;;  %v1715_v4 = vld [vmem:[%s2273_s1 + $0x8] sm:$0xff] (!%p166_p9)   ;;  %v1717_v6 = vld [vmem:[%s2273_s1 + $0x10] sm:$0xff] (!%p166_p9)   ;;  %vm525_vm1 = vcmask (!%p166_p9), 523264   ;;  %vm573_vm2 = vcmask (!%p166_p9), 130048  }
   0xf   : > { %1524 = vmatpush3.bf16.msra.mxu1 (!%p166_p9), %v1711_v0  ;;  %1539 = vmatprep.mubr.msk.bf16.mxu1 (!%p166_p9), %vm1849_vm0, %v1848_v1  ;;  %v1716_v7 = vld [vmem:[%s2273_s1 + $0x98] sm:$0xff] (!%p166_p9)   ;;  %v1718_v9 = vld [vmem:[%s2273_s1 + $0xa0] sm:$0xff] (!%p166_p9)   ;;  %v1720_v10 = vld [vmem:[%s2273_s1 + $0xa8] sm:$0xff] (!%p166_p9)   ;;  %vm1083_vm3 = vcmask (!%p166_p9), 1048064   ;;  %s188_s23 = sand.u32 (!%p166_p9), 1, %s1838_s16  }
  0x10   : > { %1525 = vmatprep.subr.bf16.mxu1 (!%p166_p9), %v1848_v1  ;;  %1519 = vmatprep.mubr.msk.bf16.mxu0 (!%p166_p9), %vm1849_vm0, %v1848_v1  ;;  %v1719_v8 = vld [vmem:[%s2273_s1 + $0x18] sm:$0xff] (!%p166_p9)   ;;  %v1721_v11 = vld [vmem:[%s2273_s1 + $0x20] sm:$0xff] (!%p166_p9)   ;;  %v1723_v12 = vld [vmem:[%s2273_s1 + $0x28] sm:$0xff] (!%p166_p9)   ;;  %s1280_s27 = sshll.u32 (!%p166_p9), %s188_s23, 4  ;;  %s2231_s10 = scalar_lea.sflag (!%p166_p9), [#allocation4], %s188_s23 }
  0x11   : > { %1504 = vmatpush3.bf16.msra.mxu0 (!%p166_p9), %v1713_v3  ;;  %v1722_v13 = vld [vmem:[%s2273_s1 + $0xb0] sm:$0xff] (!%p166_p9)   ;;  %v1724_v15 = vld [vmem:[%s2273_s1 + $0xb8] sm:$0xff] (!%p166_p9)   ;;  %v1728_v18 = vld [vmem:[%s2273_s1 + $0x100] sm:$0xff] (!%p166_p9)   ;;  %s190_s30 = scalar_lea.vmem (!%p166_p9), [#allocation3], %s1280_s27 }
  0x12   : > { %1505 = vmatprep.subr.bf16.mxu0 (!%p166_p9), %v1848_v1  ;;  %v1725_v14 = vld [vmem:[%s2273_s1 + $0x30] sm:$0xff] (!%p166_p9)   ;;  %v1727_v16 = vld [vmem:[%s2273_s1 + $0x38] sm:$0xff] (!%p166_p9)   ;;  %v1729_v19 = vld [vmem:[%s2273_s1 + $0x108] sm:$0xff] (!%p166_p9)   ;;  %s1214_s5 = sshll.u32 (!%p166_p9), %s190_s30, 4  ;;  %s2224_s5 = int_to_ptr.vmem [resolvable:$true] %s1214_s5 }
  0x13   : > { %1526 = vmatpush3.bf16.msra.mxu1 (!%p166_p9), %v1712_v2  ;;  %v1730_v20 = vld [vmem:[%s2273_s1 + $0x110] sm:$0xff] (!%p166_p9)   ;;  %v1731_v21 = vld [vmem:[%s2273_s1 + $0x118] sm:$0xff] (!%p166_p9)   ;;  %v1732_v22 = vld [vmem:[%s2273_s1 + $0x120] sm:$0xff] (!%p166_p9)  }
  0x14   : > { %1527 = vmatprep.subr.bf16.mxu1 (!%p166_p9), %v1848_v1  ;;  %v1733_v23 = vld [vmem:[%s2273_s1 + $0x128] sm:$0xff] (!%p166_p9)   ;;  %v1734_v24 = vld [vmem:[%s2273_s1 + $0x130] sm:$0xff] (!%p166_p9)   ;;  %v1735_v25 = vld [vmem:[%s2273_s1 + $0x138] sm:$0xff] (!%p166_p9)  }
  0x15   : > { %s192_s11 = scalar_select %p191_p10, %s1900_s19, 1  ;;  %1506 = vmatpush3.bf16.msra.mxu0 %v1715_v4  ;;  %v1736_v44 = vld [vmem:[%s2273_s1 + $0xc0] sm:$0xff]   ;;  %v1737_v47 = vld [vmem:[%s2273_s1 + $0xc8] sm:$0xff]   ;;  %v1738_v50 = vld [vmem:[%s2273_s1 + $0xd0] sm:$0xff]  }
  0x16   : > { %1507 = vmatprep.subr.bf16.mxu0 %v1848_v1  ;;  %v1740_v51 = vld [vmem:[%s2273_s1 + $0xd8] sm:$0xff]   ;;  %v1742_v52 = vld [vmem:[%s2273_s1 + $0xe0] sm:$0xff]   ;;  %v1744_v53 = vld [vmem:[%s2273_s1 + $0xe8] sm:$0xff]  }
  0x17   : > { %1528 = vmatpush3.bf16.msra.mxu1 %v1714_v5  ;;  %s1430_s22 = sshll.u32 %s192_s11, 3  ;;  %v1746_v54 = vld [vmem:[%s2273_s1 + $0xf0] sm:$0xff]   ;;  %v1748_v55 = vld [vmem:[%s2273_s1 + $0xf8] sm:$0xff]   ;;  %v1739_v0 = vld [vmem:[%s2273_s1 + $0x40] sm:$0xff]   ;;  %s1851_s11 = smov [#allocation3]  }
  0x18   : > { %1529 = vmatprep.subr.bf16.mxu1 %v1848_v1  ;;  %s195_s6 = scalar_lea.vmem %s2272_s0, %s1430_s22  ;;  %v1741_v3 = vld [vmem:[%s2273_s1 + $0x48] sm:$0xff]   ;;  %v1743_v4 = vld [vmem:[%s2273_s1 + $0x50] sm:$0xff]   ;;  %v1745_v5 = vld [vmem:[%s2273_s1 + $0x58] sm:$0xff]   ;;  %s1850_s22 = smov 64  }
  0x19   : > { %1508 = vmatpush3.bf16.msra.mxu0 %v1717_v6  ;;  %v1999_v17 = vld [vmem:[%s195_s6] sm:$0xff]   ;;  %s1431_s6 = sshll.u32 %s1900_s19, 8  ;;  %s1784_s19 = scalar_lea.vmem %s2224_s5, 256 }
  0x1a   : > { %1509 = vmatprep.subr.bf16.mxu0 %v1848_v1  ;;  %v1747_v6 = vld [vmem:[%s2273_s1 + $0x60] sm:$0xff]   ;;  %s2229_s9 = scalar_lea.hbm %s2276_s4, %s1431_s6  ;;  %p1785_p11 = scmp.ne.s32.totalorder %s2224_s5, %s1784_s19 }
  0x1b   : > { %1530 = vmatpush3.bf16.msra.mxu1 %v1716_v7  ;;  %v1749_v7 = vld [vmem:[%s2273_s1 + $0x68] sm:$0xff]   ;;  %s1788_s12 = sshll.u32 %s1851_s11, 4  ;;  %s1789_s12 = int_to_ptr.vmem [resolvable:$false] %s1788_s12 }
  0x1c   : > { %1531 = vmatprep.subr.bf16.mxu1 %v1848_v1  ;;  %p1786_p12 = pnand %p1785_p11, %p1917_p5  ;;  %s1790_s13 = scalar_lea.vmem %s1789_s12, 512 }
  0x1d   : > { %1510 = vmatpush3.bf16.msra.mxu0 %v1719_v8  ;;  %v1750_v8 = vld [vmem:[%s2273_s1 + $0x70] sm:$0xff]   ;;  %p1791_p0 = scmp.lt.s32.totalorder %s2224_s5, %s1789_s12  ;;  %p1792_p1 = scmp.lt.s32.totalorder %s1790_s13, %s1784_s19 }
  0x1e   : > { %1511 = vmatprep.subr.bf16.mxu0 %v1848_v1  ;;  %p1787_p13 = pneg %p1786_p12 }
  0x1f   : > { %1532 = vmatpush3.bf16.msra.mxu1 %v1718_v9  ;;  %v1751_v9 = vld [vmem:[%s2273_s1 + $0x78] sm:$0xff]   ;;  %p1793_p2 = por %p1792_p1, %p1791_p0 }
  0x20   : > { %1533 = vmatprep.subr.bf16.mxu1 %v1848_v1 }
  0x21   : > { %1512 = vmatpush3.bf16.msra.mxu0 %v1721_v11  ;;  %v1753_v11 = vld [vmem:[%s2273_s1 + $0x148] sm:$0xff]   ;;  %p1794_p3 = pnand %p1793_p2, %p1787_p13 }
  0x22   : > { %1513 = vmatprep.subr.bf16.mxu0 %v1848_v1 }
  0x23   : > { %1534 = vmatpush3.bf16.msra.mxu1 %v1720_v10  ;;  %v1752_v10 = vld [vmem:[%s2273_s1 + $0x140] sm:$0xff]  }
  0x24   : > { %1535 = vmatprep.subr.bf16.mxu1 %v1848_v1 }
  0x25   : > { %1514 = vmatpush3.bf16.msra.mxu0 %v1723_v12  ;;  %v1754_v12 = vld [vmem:[%s2273_s1 + $0x150] sm:$0xff]  }
  0x26   : > { %1515 = vmatprep.subr.bf16.mxu0 %v1848_v1 }
  0x27   : > { %1536 = vmatpush3.bf16.msra.mxu1 %v1722_v13  ;;  %v1755_v13 = vld [vmem:[%s2273_s1 + $0x158] sm:$0xff]  }
  0x28   : > { %1537 = vmatprep.subr.bf16.mxu1 %v1848_v1 }
  0x29   : > { %1516 = vmatpush3.bf16.msra.mxu0 %v1725_v14  ;;  %v1756_v14 = vld [vmem:[%s2273_s1 + $0x160] sm:$0xff]  }
  0x2a   : > { %1517 = vmatprep.subr.bf16.mxu0 %v1848_v1 }
  0x2b   : > { %1538 = vmatpush3.bf16.msra.mxu1 %v1724_v15  ;;  %v1757_v15 = vld [vmem:[%s2273_s1 + $0x168] sm:$0xff]  }
  0x2c   : > { %1563 = vmatprep.subr.bf16.mxu1 %v1848_v1 }
  0x2d   : > { %1518 = vmatpush3.bf16.msra.mxu0 %v1727_v16  ;;  %v1758_v16 = vld [vmem:[%s2273_s1 + $0x170] sm:$0xff]  }
  0x2e   : > { %1540 = vmatmul.mubr.bf16.vlgmr.msra.gmra.mrb[0].mxu1 %v1999_v17  ;;  %1543 = vmatprep.subr.bf16.mxu0 %v1848_v1 }
  0x2f   : > { %1565 = vmatprep.mubr.msk.bf16.mxu1 %vm1849_vm0, %v1848_v1 }
  0x30   : > { %1520 = vmatmul.mubr.bf16.vlgmr.msra.gmra.mrb[0].mxu0 %v1999_v17 }
  0x31   : > { %1559 = vmatprep.mubr.msk.bf16.mxu0 %vm1849_vm0, %v1848_v1  ;;  %1544 = vmatpush3.bf16.msra.mxu0 %v1728_v18  ;;  %v1759_v18 = vld [vmem:[%s2273_s1 + $0x178] sm:$0xff]  }
  0x32   : > { %1545 = vmatprep.subr.bf16.mxu0 %v1848_v1 }
  0x35   : > { %1546 = vmatpush3.bf16.msra.mxu0 %v1729_v19 }
  0x36   : > { %1547 = vmatprep.subr.bf16.mxu0 %v1848_v1 }
  0x39   : > { %1548 = vmatpush3.bf16.msra.mxu0 %v1730_v20 }
  0x3a   : > { %1549 = vmatprep.subr.bf16.mxu0 %v1848_v1 }
  0x3d   : > { %1550 = vmatpush3.bf16.msra.mxu0 %v1731_v21 }
  0x3e   : > { %1551 = vmatprep.subr.bf16.mxu0 %v1848_v1 }
  0x41   : > { %1552 = vmatpush3.bf16.msra.mxu0 %v1732_v22 }
  0x42   : > { %1553 = vmatprep.subr.bf16.mxu0 %v1848_v1 }
  0x45   : > { %1554 = vmatpush3.bf16.msra.mxu0 %v1733_v23 }
  0x46   : > { %1555 = vmatprep.subr.bf16.mxu0 %v1848_v1 }
  0x49   : > { %1556 = vmatpush3.bf16.msra.mxu0 %v1734_v24 }
  0x4a   : > { %1557 = vmatprep.subr.bf16.mxu0 %v1848_v1 }
  0x4d   : > { %1558 = vmatpush3.bf16.msra.mxu0 %v1735_v25 }
  0x4e   : > { %1595 = vmatprep.subr.bf16.mxu0 %v1848_v1 }
  0x50   : > { %1560 = vmatmul.mubr.bf16.vlgmr.msra.gmra.mrb[4].mxu0 %v1999_v17 }
  0x51   : > { %1611 = vmatprep.mubr.msk.bf16.mxu0 %vm1849_vm0, %v1848_v1  ;;  %1596 = vmatpush3.bf16.msra.mxu0 %v1736_v44 }
  0x52   : > { %1597 = vmatprep.subr.bf16.mxu0 %v1848_v1 }
  0x55   : > { %1598 = vmatpush3.bf16.msra.mxu0 %v1737_v47 }
  0x56   : > { %1599 = vmatprep.subr.bf16.mxu0 %v1848_v1 }
  0x59   : > { %1600 = vmatpush3.bf16.msra.mxu0 %v1738_v50 }
  0x5a   : > { %1601 = vmatprep.subr.bf16.mxu0 %v1848_v1 }
  0x5d   : > { %1602 = vmatpush3.bf16.msra.mxu0 %v1740_v51 }
  0x5e   : > { %1603 = vmatprep.subr.bf16.mxu0 %v1848_v1 }
  0x61   : > { %1604 = vmatpush3.bf16.msra.mxu0 %v1742_v52 }
  0x62   : > { %1605 = vmatprep.subr.bf16.mxu0 %v1848_v1 }
  0x65   : > { %1606 = vmatpush3.bf16.msra.mxu0 %v1744_v53 }
  0x66   : > { %1607 = vmatprep.subr.bf16.mxu0 %v1848_v1 }
  0x69   : > { %1608 = vmatpush3.bf16.msra.mxu0 %v1746_v54 }
  0x6a   : > { %1609 = vmatprep.subr.bf16.mxu0 %v1848_v1 }
  0x6d   : > { %1610 = vmatpush3.bf16.msra.mxu0 %v1748_v55 }
  0x6e   : > { %1647 = vmatprep.subr.bf16.mxu0 %v1848_v1 }
  0x70   : > { %1612 = vmatmul.mubr.bf16.vlgmr.msra.gmra.mrb[8].mxu0 %v1999_v17 }
  0x71   : > { %1663 = vmatprep.mubr.msk.bf16.mxu0 %vm1849_vm0, %v1848_v1 }
 0x101   : > { %v409_v26 = vpop.f32.mrb[0].mxu1 }
 0x102   : > { %v1541_v27 = vpop.f32.mrb[1].mxu1 }
 0x103   : > { %v412_v28 = vpop.f32.mrb[2].mxu1  ;;  %v303_v29 = vpop.f32.mrb[0].mxu0 }
 0x104   : > { %v524_v30 = vpack.c.bf16 %v412_v28, %v409_v26  ;;  %v1542_v31 = vpop.f32.mrb[3].mxu1  ;;  %v1521_v32 = vpop.f32.mrb[1].mxu0 }
 0x105   : > { %v306_v33 = vpop.f32.mrb[2].mxu0 }
 0x106   : > { %v530_v34 = vsel %vm525_vm1, %v524_v30, 0  ;;  %v523_v35 = vpack.c.bf16 %v306_v33, %v303_v29  ;;  %v1522_v36 = vpop.f32.mrb[3].mxu0 }
 0x107   : > { %1564 = vmatpush3.bf16.xpose.msra.mxu1 %v530_v34 }
 0x108   : > { %1569 = vmatprep.subr.bf16.mxu1 %v1848_v1 }
 0x10e   : > { %1566 = vmatmul.mubr.msk.bf16.vlgmr.msra.gmra.mrb[4].mxu1 %vm525_vm1, %v523_v35 }
 0x10f   : > { %1571 = vmatprep.mubr.msk.bf16.mxu1 %vm1849_vm0, %v1848_v1 }
 0x123   : > { %v515_v43 = vpop.f32.mrb[4].mxu0 }
 0x124   : > { %v1561_v45 = vpop.f32.mrb[5].mxu0 }
 0x125   : > { %v518_v46 = vpop.f32.mrb[6].mxu0 }
 0x126   : > { %v522_v48 = vpack.c.bf16 %v518_v46, %v515_v43  ;;  %v1562_v49 = vpop.f32.mrb[7].mxu0 }
 0x128   : > { %1570 = vmatpush3.bf16.msra.mxu1 %v522_v48 }
 0x129   : > { %1575 = vmatprep.subr.bf16.mxu1 %v1848_v1 }
 0x143   : > { %v848_v19 = vpop.f32.mrb[8].mxu0 }
 0x144   : > { %v1613_v20 = vpop.f32.mrb[9].mxu0 }
 0x145   : > { %v851_v21 = vpop.f32.mrb[10].mxu0 }
 0x146   : > { %v963_v22 = vpack.c.bf16 %v851_v21, %v848_v19  ;;  %v1614_v23 = vpop.f32.mrb[11].mxu0 }
 0x148   : > { %v968_v24 = vsel %vm525_vm1, %v963_v22, 0 }
 0x1e1   : > { %v566_v37 = vpop.f32.mrb[4].mxu1 }
 0x1e2   : > { %v1567_v38 = vpop.f32.mrb[5].mxu1  ;;  %v574_v39 = vsel %vm573_vm2, %v566_v37, -inf }
 0x1e3   : > { %575 = vmax.xlane.f32.xlu0 %v574_v39  ;;  %v569_v40 = vpop.f32.mrb[6].mxu1 }
 0x1e4   : > { %v1568_v41 = vpop.f32.mrb[7].mxu1  ;;  %v577_v42 = vsel %vm573_vm2, %v569_v40, -inf }
 0x1e7   : > { %578 = vmax.xlane.f32.xlu0 %v577_v42 }
 0x270   : > { %v576_v56 = vpop.xlane.xlu0 %575 }
 0x271   : > { %v580_v57 = vsub.f32 %v566_v37, %v576_v56 }
 0x273   : > { %v582_v58 = vmul.f32 1.442695, %v580_v57  ;;  %v1760_v57 = vld [vmem:[%s2274_s2] sm:$0xff]  }
 0x274   : > { %v579_v59 = vpop.xlane.xlu0 %578  ;;  %1648 = vmatpush3.bf16.msra.mxu0 %v1760_v57 }
 0x275   : > { %v581_v60 = vsub.f32 %v569_v40, %v579_v59  ;;  %1768 = vpow2.f32 %v582_v58  ;;  %v1761_v58 = vld [vmem:[%s2274_s2 + $0x8] sm:$0xff]   ;;  %1649 = vmatprep.subr.bf16.mxu0 %v1848_v1  ;;  %v1762_v59 = vld [vmem:[%s2274_s2 + $0x10] sm:$0xff]  }
 0x277   : > { %v584_v61 = vmul.f32 1.442695, %v581_v60  ;;  %v1763_v60 = vld [vmem:[%s2274_s2 + $0x18] sm:$0xff]  }
 0x278   : > { %1650 = vmatpush3.bf16.msra.mxu0 %v1761_v58 }
 0x279   : > { %1770 = vpow2.f32 %v584_v61  ;;  %1651 = vmatprep.subr.bf16.mxu0 %v1848_v1  ;;  %v1764_v61 = vld [vmem:[%s2274_s2 + $0x20] sm:$0xff]  }
 0x27c   : > { %1652 = vmatpush3.bf16.msra.mxu0 %v1762_v59 }
 0x27d   : > { %1653 = vmatprep.subr.bf16.mxu0 %v1848_v1 }
 0x27f   : > { %v2088_v62 = vpop.eup %1768 }
 0x280   : > { %v586_v53 = vsel %vm573_vm2, %v2088_v62, 0.0  ;;  %1654 = vmatpush3.bf16.msra.mxu0 %v1763_v60 }
 0x281   : > { %1655 = vmatprep.subr.bf16.mxu0 %v1848_v1 }
 0x283   : > { %v2090_v63 = vpop.eup %1770 }
 0x284   : > { %v592_v2 = vpack.c.bf16 %v2090_v63, %v2088_v62  ;;  %v589_v56 = vsel %vm573_vm2, %v2090_v63, 0.0  ;;  %1656 = vmatpush3.bf16.msra.mxu0 %v1764_v61  ;;  %v1765_v62 = vld [vmem:[%s2274_s2 + $0x28] sm:$0xff]  }
 0x285   : > { %1657 = vmatprep.subr.bf16.mxu0 %v1848_v1 }
 0x286   : > { %1572 = vmatmul.mubr.msk.bf16.vlgmr.msra.gmra.mrb[8].mxu1 %vm573_vm2, %v592_v2 }
 0x287   : > { %1576 = vmatpush3.bf16.msra.mxu1 %v1739_v0  ;;  %1591 = vmatprep.mubr.msk.bf16.mxu1 %vm1849_vm0, %v1848_v1 }
 0x288   : > { %1577 = vmatprep.subr.bf16.mxu1 %v1848_v1  ;;  %1658 = vmatpush3.bf16.msra.mxu0 %v1765_v62 }
 0x289   : > { %1659 = vmatprep.subr.bf16.mxu0 %v1848_v1 }
 0x28b   : > { %1578 = vmatpush3.bf16.msra.mxu1 %v1741_v3 }
 0x28c   : > { %1579 = vmatprep.subr.bf16.mxu1 %v1848_v1 }
 0x28f   : > { %1580 = vmatpush3.bf16.msra.mxu1 %v1743_v4 }
 0x290   : > { %1581 = vmatprep.subr.bf16.mxu1 %v1848_v1 }
 0x293   : > { %1582 = vmatpush3.bf16.msra.mxu1 %v1745_v5 }
 0x294   : > { %1583 = vmatprep.subr.bf16.mxu1 %v1848_v1 }
 0x297   : > { %1584 = vmatpush3.bf16.msra.mxu1 %v1747_v6 }
 0x298   : > { %1585 = vmatprep.subr.bf16.mxu1 %v1848_v1 }
 0x29b   : > { %1586 = vmatpush3.bf16.msra.mxu1 %v1749_v7 }
 0x29c   : > { %1587 = vmatprep.subr.bf16.mxu1 %v1848_v1 }
 0x29f   : > { %1588 = vmatpush3.bf16.msra.mxu1 %v1750_v8 }
 0x2a0   : > { %1589 = vmatprep.subr.bf16.mxu1 %v1848_v1 }
 0x2a3   : > { %1590 = vmatpush3.bf16.msra.mxu1 %v1751_v9  ;;  %v1766_v9 = vld [vmem:[%s2274_s2 + $0x30] sm:$0xff]  }
 0x2a4   : > { %1615 = vmatprep.subr.bf16.mxu1 %v1848_v1  ;;  %1660 = vmatpush3.bf16.msra.mxu0 %v1766_v9 }
 0x2a5   : > { %1661 = vmatprep.subr.bf16.mxu0 %v1848_v1 }
 0x2a6   : > { %1592 = vmatmul.mubr.bf16.vlgmr.msra.gmra.mrb[12].mxu1 %v1999_v17 }
 0x2a7   : > { %1616 = vmatpush3.bf16.msra.mxu1 %v1752_v10  ;;  %1631 = vmatprep.mubr.msk.bf16.mxu1 %vm1849_vm0, %v1848_v1  ;;  %v1767_v10 = vld [vmem:[%s2274_s2 + $0x38] sm:$0xff]  }
 0x2a8   : > { %1617 = vmatprep.subr.bf16.mxu1 %v1848_v1  ;;  %1662 = vmatpush3.bf16.msra.mxu0 %v1767_v10 }
 0x2ab   : > { %1618 = vmatpush3.bf16.msra.mxu1 %v1753_v11 }
 0x2ac   : > { %1619 = vmatprep.subr.bf16.mxu1 %v1848_v1 }
 0x2af   : > { %1620 = vmatpush3.bf16.msra.mxu1 %v1754_v12 }
 0x2b0   : > { %1621 = vmatprep.subr.bf16.mxu1 %v1848_v1 }
 0x2b3   : > { %1622 = vmatpush3.bf16.msra.mxu1 %v1755_v13 }
 0x2b4   : > { %1623 = vmatprep.subr.bf16.mxu1 %v1848_v1 }
 0x2b7   : > { %1624 = vmatpush3.bf16.msra.mxu1 %v1756_v14 }
 0x2b8   : > { %1625 = vmatprep.subr.bf16.mxu1 %v1848_v1 }
 0x2bb   : > { %1626 = vmatpush3.bf16.msra.mxu1 %v1757_v15 }
 0x2bc   : > { %1627 = vmatprep.subr.bf16.mxu1 %v1848_v1 }
 0x2bf   : > { %1628 = vmatpush3.bf16.msra.mxu1 %v1758_v16 }
 0x2c0   : > { %1629 = vmatprep.subr.bf16.mxu1 %v1848_v1 }
 0x2c3   : > { %1630 = vmatpush3.bf16.msra.mxu1 %v1759_v18 }
 0x2c4   : > { %1635 = vmatprep.subr.bf16.mxu1 %v1848_v1 }
 0x2c6   : > { %1632 = vmatmul.mubr.bf16.vlgmr.msra.gmra.mrb[16].mxu1 %v1999_v17 }
 0x2c7   : > { %1637 = vmatprep.mubr.msk.bf16.mxu1 %vm1849_vm0, %v1848_v1 }
 0x2cc   : > { %1636 = vmatpush3.bf16.xpose.msra.mxu1 %v968_v24 }
 0x2cd   : > { %1641 = vmatprep.subr.bf16.mxu1 %v1848_v1 }
 0x359   : > { %v2169_v25 = vpop.f32.mrb[8].mxu1 }
 0x35a   : > { %v1573_v26 = vpop.f32.mrb[9].mxu1 }
 0x35b   : > { %v2171_v27 = vpop.f32.mrb[10].mxu1 }
 0x35c   : > { %v1574_v28 = vpop.f32.mrb[11].mxu1 }
 0x379   : > { %v742_v29 = vpop.f32.mrb[12].mxu1 }
 0x37a   : > { %v1593_v30 = vpop.f32.mrb[13].mxu1 }
 0x37b   : > { %v745_v17 = vpop.f32.mrb[14].mxu1 }
 0x37c   : > { %v962_v31 = vpack.c.bf16 %v745_v17, %v742_v29  ;;  %v1594_v32 = vpop.f32.mrb[15].mxu1 }
 0x37e   : > { %1638 = vmatmul.mubr.msk.bf16.vlgmr.msra.gmra.mrb[20].mxu1 %vm525_vm1, %v962_v31 }
 0x37f   : > { %1643 = vmatprep.mubr.msk.bf16.mxu1 %vm1849_vm0, %v1848_v1  ;;  %v1416_v1 = vld [vmem:[%s2275_s3] ss:$0 sm:$0xff] }
 0x399   : > { %v954_v33 = vpop.f32.mrb[16].mxu1 }
 0x39a   : > { %v1633_v34 = vpop.f32.mrb[17].mxu1 }
 0x39b   : > { %v957_v35 = vpop.f32.mrb[18].mxu1 }
 0x39c   : > { %v961_v36 = vpack.c.bf16 %v957_v35, %v954_v33  ;;  %v1634_v37 = vpop.f32.mrb[19].mxu1 }
 0x39e   : > { %1642 = vmatpush3.bf16.msra.mxu1 %v961_v36 }
 0x451   : > { %v1004_v38 = vpop.f32.mrb[20].mxu1 }
 0x452   : > { %v1639_v39 = vpop.f32.mrb[21].mxu1  ;;  %v1011_v40 = vsel %vm573_vm2, %v1004_v38, -inf }
 0x453   : > { %1012 = vmax.xlane.f32.xlu1 %v1011_v40  ;;  %v1007_v41 = vpop.f32.mrb[22].mxu1 }
 0x454   : > { %v1640_v42 = vpop.f32.mrb[23].mxu1  ;;  %v1014_v43 = vsel %vm573_vm2, %v1007_v41, -inf }
 0x457   : > { %1015 = vmax.xlane.f32.xlu1 %v1014_v43 }
 0x4e0   : > { %v1013_v44 = vpop.xlane.xlu1 %1012 }
 0x4e1   : > { %v1017_v45 = vsub.f32 %v1004_v38, %v1013_v44 }
 0x4e3   : > { %v1019_v46 = vmul.f32 1.442695, %v1017_v45 }
 0x4e4   : > { %v1016_v47 = vpop.xlane.xlu1 %1015 }
 0x4e5   : > { %1772 = vpow2.f32 %v1019_v46  ;;  %v1018_v48 = vsub.f32 %v1007_v41, %v1016_v47 }
 0x4e7   : > { %v1021_v49 = vmul.f32 1.442695, %v1018_v48 }
 0x4e9   : > { %1774 = vpow2.f32 %v1021_v49 }
 0x4ef   : > { %v1773_v50 = vpop.eup %1772 }
 0x4f0   : > { %v1023_v51 = vsel %vm573_vm2, %v1773_v50, 0.0 }
 0x4f1   : > { %1024 = vadd.xlane.f32.xlu0 %v1023_v51 }
 0x4f3   : > { %v1775_v52 = vpop.eup %1774 }
 0x4f4   : > { %v1026_v54 = vsel %vm573_vm2, %v1775_v52, 0.0  ;;  %v1029_v55 = vpack.c.bf16 %v1775_v52, %v1773_v50 }
 0x4f5   : > { %587 = vadd.xlane.f32.xlu0 %v586_v53  ;;  %1027 = vadd.xlane.f32.xlu1 %v1026_v54 }
 0x4f6   : > { %1644 = vmatmul.mubr.msk.bf16.vlgmr.msra.gmra.mrb[24].mxu1 %vm573_vm2, %v1029_v55 }
 0x4f9   : > { %590 = vadd.xlane.f32.xlu1 %v589_v56 }
 0x57e   : > { %v1025_v63 = vpop.xlane.xlu0 %1024 }
 0x582   : > { %v588_v0 = vpop.xlane.xlu0 %587  ;;  %v1028_v2 = vpop.xlane.xlu1 %1027 }
 0x583   : > { %1776 = vrcp.f32 %v588_v0 }
 0x586   : > { %v591_v3 = vpop.xlane.xlu1 %590 }
 0x587   : > { %1778 = vrcp.f32 %v591_v3 }
 0x588   : > { %1780 = vrcp.f32 %v1025_v63 }
 0x589   : > { %1782 = vrcp.f32 %v1028_v2 }
 0x58d   : > { %v1777_v4 = vpop.eup %1776 }
 0x58e   : > { %v639_v6 = vmul.f32 %v1777_v4, %v2169_v25 }
 0x591   : > { %v1779_v5 = vpop.eup %1778 }
 0x592   : > { %v640_v7 = vmul.f32 %v1779_v5, %v2171_v27  ;;  %v1781_v12 = vpop.eup %1780 }
 0x593   : > { %v1783_v14 = vpop.eup %1782 }
 0x594   : > { %v641_v8 = vpack.c.bf16 %v640_v7, %v639_v6 }
 0x596   : > { %642 = vst.msk [vmem:[#allocation2] sm:$0xff] %vm525_vm1, %v641_v8 }
 0x5c9   : > { %v1067_v11 = vpop.f32.mrb[24].mxu1 }
 0x5ca   : > { %v1645_v13 = vpop.f32.mrb[25].mxu1  ;;  %v1076_v16 = vmul.f32 %v1781_v12, %v1067_v11 }
 0x5cb   : > { %v1070_v15 = vpop.f32.mrb[26].mxu1 }
 0x5cc   : > { %v1077_v18 = vmul.f32 %v1783_v14, %v1070_v15  ;;  %v1646_v19 = vpop.f32.mrb[27].mxu1 }
 0x5ce   : > { %v1078_v20 = vpack.c.bf16 %v1077_v18, %v1076_v16 }
 0x5d0   : > { %1080 = vrot.lane.b32.xlu0 %v1078_v20, %s1850_s22 }
 0x642   : > { %v1081_v21 = vpop.permute.xlu0 %1080 }
 0x643   : > { %1084 = vst.msk [vmem:[#allocation2] sm:$0xff] %vm1083_vm3, %v1081_v21 }
 0x64a   : > { %v1085_v22 = vld [vmem:[#allocation2] sm:$0xff] }
 0x64b   : > { %1664 = vmatmul.mubr.bf16.vlgmr.msra.gmra.mrb[12].mxu0 %v1085_v22 }
 0x71e   : > { %v1191_v23 = vpop.f32.mrb[12].mxu0 }
 0x71f   : > { %v1192_v24 = vadd.f32 %v1416_v1, %v1191_v23  ;;  %v1665_v25 = vpop.f32.mrb[13].mxu0 }
 0x720   : > { %v1194_v26 = vpop.f32.mrb[14].mxu0 }
 0x721   : > { %1198 = vst [vmem:[%s190_s30] sm:$0xff] %v1192_v24  ;;  %v1195_v27 = vadd.f32 %v1416_v1, %v1194_v26  ;;  %v1666_v28 = vpop.f32.mrb[15].mxu0 }
 0x723   : > { %1199 = vst [vmem:[%s190_s30 + $0x8] sm:$0xff] %v1195_v27 }
 0x724   : > { %1797 = shalt.err (!%p1794_p3)
}
 0x725   : > { %s1798_s14 = scalar_lea.hbm %s2229_s9, 256  ;;  %s1802_s23 = scalar_lea.hbm %s2276_s4, 512 }
 0x726   : > { %p1799_p4 = scmp.ne.s32.totalorder %s2229_s9, %s1798_s14  ;;  %p1803_p9 = scmp.lt.u32.totalorder %s2229_s9, %s2276_s4 }
 0x727   : > { %p1804_p10 = scmp.lt.u32.totalorder %s1802_s23, %s1798_s14  ;;  %p1806_p12 = scmp.lt.u32.totalorder %s1798_s14, %s2229_s9 }
 0x728   : > { %p1800_p7 = pnand %p1799_p4, %p1917_p5 }
 0x729   : > { %p1805_p11 = por %p1804_p10, %p1803_p9 }
 0x72a   : > { %p1801_p8 = pneg %p1800_p7 }
 0x72b   : > { %p1807_p13 = por %p1806_p12, %p1805_p11 }
 0x72d   : > { %p1808_p0 = pnand %p1807_p13, %p1801_p8 }
 0x72f   : > { %1811 = shalt.err (!%p1808_p0)
}
 0x730   : > { %s1852_s29 = smov 128   ;;  %s1853_s30 = smov 8  }
 0x731   : > { %1667 = dma.vmem_to_hbm [thread:$0]  (%p1917_p5), %s2224_s5, 256, %s2229_s9, %s2231_s10, %s1852_s29, %s1852_s29, %s1853_s30  }
 0x732 PF: > { %p1673_p1 = scmp.ge.s32.totalorder %s1846_s18, 2  ;;  %s1229_s6 = sand.u32 1, %s1834_s15  }
 0x733   : > { %s1230_s7 = scalar_lea.sflag [#allocation4], %s1229_s6 }
 0x734   : > { %p1670_p2 = pnand %p1673_p1, %p1921_p6 }
 0x736   : > { %1829 = dma.done.wait (!%p1670_p2), %s1230_s7, 256  }
 0x737   : > { %1831 = vsyncadd (!%p1670_p2), %s1230_s7, 4294967040  ;;  %p14_p3 = scmp.ge.s32.totalorder %s1904_s21, 4   ;;  %s2279_s15 = smov %s1838_s16 }
 0x738   : > { %s2280_s16 = smov %s1842_s17  ;;  %s2281_s17 = smov %s1915_s24 }
 0x739   : > { %s2282_s18 = smov %s1904_s21  ;;  %16 = sbr.rel (!%p14_p3) target bundleno = 3 (0x3), region = 76 }
 0x740   :  { %1235 = vsyncpa [#allocation4], 1 }
 0x741   :  { %1237 = vsyncpa [#allocation4 + $0x1], 1 }

</bundles_post_ra>
